<compile_context>
chip_gen: v6e
topology: v6e:2x2x1
jax: 0.10.0
libtpu: 0.0.40
codegen_flags: <defaults>
</compile_context>

<pallas_src>
import jax
import jax.numpy as jnp
from jax.experimental import pallas as pl
from jax.experimental.pallas import tpu as pltpu


def _adjust_kernel(x_ref, w_ref, shift_ref, o_ref):
    # x_ref:     (tile_rows, C_in)   rows of the NHWC-flattened input (source dtype)
    # w_ref:     (C_in, C_out)       1x1 conv weight with BN scale folded in (bf16)
    # shift_ref: (1, C_out)          folded BN shift (f32), lane-dense
    # o_ref:     (tile_rows, C_out)  output rows (bf16), C_out lane-dense
    x = x_ref[...].astype(w_ref.dtype)                       # VPU cast under DMA shadow
    acc = jnp.dot(x, w_ref[...], preferred_element_type=jnp.float32)
    o_ref[...] = (acc + shift_ref[...]).astype(o_ref.dtype)


def adjust_layer_forward(x_nchw, conv_w, gamma, beta, running_mean, running_var,
                         center_size=7, eps=1e-5,
                         compute_dtype=jnp.bfloat16, out_dtype=jnp.bfloat16,
                         tile_rows=256):
    """x_nchw: [B, C_in, H, W]; conv_w: [C_out, C_in, 1, 1] (bias-free)."""
    B, C_in, H, W = x_nchw.shape
    C_out, c_in_w, kh, kw = conv_w.shape
    assert c_in_w == C_in, (c_in_w, C_in)
    # Crop-before-conv is only valid for a pointwise (1x1, stride-1, pad-0) conv.
    assert (kh, kw) == (1, 1), "crop-before-conv requires a 1x1 conv"

    # A 1x1 / stride-1 conv preserves spatial size, so PyTorch's W<20 check on
    # the conv OUTPUT equals the same check on the input.
    if W < 20:
        l = (W - center_size) // 2
        r = l + center_size
        x_nchw = x_nchw[:, :, l:r, l:r]
        H = W = center_size

    # Rows = flattened (b, h, w); contraction over C_in; C_out lane-dense out.
    n_rows = B * H * W
    x_rows = jnp.transpose(x_nchw, (0, 2, 3, 1)).reshape(n_rows, C_in)

    # Fold BN (inference) into the conv weight + per-channel shift.
    scale = gamma / jnp.sqrt(running_var + eps)                          # [C_out]
    shift = (beta - running_mean * scale).reshape(1, C_out).astype(jnp.float32)
    w_folded = (conv_w.reshape(C_out, C_in).astype(jnp.float32)
                * scale[:, None]).T.astype(compute_dtype)                # [C_in, C_out]

    # Row tile: 256 rows (multiple of 8 sublanes) or the whole thing if smaller.
    tr = tile_rows if n_rows >= tile_rows else n_rows
    grid = (pl.cdiv(n_rows, tr),)

    cost = pl.CostEstimate(
        flops=2 * n_rows * C_in * C_out,
        transcendentals=0,
        bytes_accessed=(x_rows.size * x_rows.dtype.itemsize
                        + w_folded.size * w_folded.dtype.itemsize
                        + shift.size * shift.dtype.itemsize
                        + n_rows * C_out * jnp.dtype(out_dtype).itemsize),
    )

    out = pl.pallas_call(
        _adjust_kernel,
        out_shape=jax.ShapeDtypeStruct((n_rows, C_out), out_dtype),
        grid=grid,
        in_specs=[
            pl.BlockSpec((tr, C_in), lambda i: (i, 0)),       # row tile of x
            pl.BlockSpec((C_in, C_out), lambda i: (0, 0)),    # folded weight (constant)
            pl.BlockSpec((1, C_out), lambda i: (0, 0)),       # folded shift (constant)
        ],
        out_specs=pl.BlockSpec((tr, C_out), lambda i: (i, 0)),
        compiler_params=pltpu.CompilerParams(
            dimension_semantics=("parallel",),                # row tiles shard across v7x TCs
            vmem_limit_bytes=32 << 20),
        cost_estimate=cost,
    )(x_rows, w_folded, shift)

    # Back to the module's NCHW output layout (small bf16 tensor).
    return out.reshape(B, H, W, C_out).transpose(0, 3, 1, 2)


if __name__ == "__main__":
    key = jax.random.PRNGKey(0)
    k_x, k_w, k_g, k_b, k_m, k_v = jax.random.split(key, 6)

    B, C_in, C_out, H, W = 2, 8, 4, 16, 16
    center_size = 7

    x = jax.random.normal(k_x, (B, C_in, H, W), dtype=jnp.float32)
    conv_w = jax.random.normal(k_w, (C_out, C_in, 1, 1), dtype=jnp.float32) * 0.1
    gamma = jax.random.normal(k_g, (C_out,), dtype=jnp.float32) * 0.1 + 1.0
    beta = jax.random.normal(k_b, (C_out,), dtype=jnp.float32) * 0.1
    running_mean = jax.random.normal(k_m, (C_out,), dtype=jnp.float32) * 0.1
    running_var = jnp.abs(jax.random.normal(k_v, (C_out,), dtype=jnp.float32)) + 0.5

    y = adjust_layer_forward(x, conv_w, gamma, beta, running_mean, running_var,
                             center_size=center_size)
    y = jax.block_until_ready(y)

    # Pure-JAX f32 reference (1x1 conv == channel einsum, BN, crop after).
    eps = 1e-5
    conv_ref = jnp.einsum("oc,bchw->bohw", conv_w.reshape(C_out, C_in), x)
    scale = gamma / jnp.sqrt(running_var + eps)
    shift = beta - running_mean * scale
    ref = conv_ref * scale[None, :, None, None] + shift[None, :, None, None]
    l = (W - center_size) // 2
    ref = ref[:, :, l:l + center_size, l:l + center_size]

    assert y.shape == (B, C_out, center_size, center_size), y.shape
    y32 = y.astype(jnp.float32)
    # Tolerance reflects intentional bf16 inputs/output (f32 MXU accumulation).
    assert jnp.allclose(y32, ref, atol=3e-2, rtol=3e-2), \
        float(jnp.max(jnp.abs(y32 - ref)))
    print("KERNEL_OK")
</pallas_src>

<mosaic_0001>
module attributes {stable_mosaic.version = 11 : i64} {
  func.func @_adjust_kernel(%arg0: i32, %arg1: memref<98x8xf32, #tpu.memory_space<vmem>>, %arg2: memref<8x4xbf16, #tpu.memory_space<vmem>>, %arg3: memref<1x4xf32, #tpu.memory_space<vmem>>, %arg4: memref<98x4xbf16, #tpu.memory_space<vmem>>) attributes {dimension_semantics = [#tpu.dimension_semantics<parallel>], iteration_bounds = array<i64: 1>, scalar_prefetch = 0 : i64, scratch_operands = 0 : i64, tpu.core_type = #tpu.core_type<tc>, window_params = [{transform_indices = @transform_0, window_bounds = array<i64: 98, 8>}, {pipeline_mode = #tpu.pipeline_mode<synchronous>, transform_indices = @transform_1, window_bounds = array<i64: 8, 4>}, {pipeline_mode = #tpu.pipeline_mode<synchronous>, transform_indices = @transform_2, window_bounds = array<i64: 1, 4>}, {transform_indices = @transform_3, window_bounds = array<i64: 98, 4>}]} {
    %c0 = arith.constant 0 : index
    %c0_0 = arith.constant 0 : index
    %0 = vector.load %arg1[%c0, %c0_0] : memref<98x8xf32, #tpu.memory_space<vmem>>, vector<98x8xf32>
    %1 = arith.truncf %0 : vector<98x8xf32> to vector<98x8xbf16>
    %c0_1 = arith.constant 0 : index
    %c0_2 = arith.constant 0 : index
    %2 = vector.load %arg2[%c0_1, %c0_2] : memref<8x4xbf16, #tpu.memory_space<vmem>>, vector<8x4xbf16>
    %cst = arith.constant dense<0.000000e+00> : vector<98x4xf32>
    %3 = tpu.matmul %1, %2, %cst {dimension_numbers = #tpu.dot_dimension_numbers<[1], [0], [0], [1], [0, 0, 1, 1], [], []>} : vector<98x8xbf16>, vector<8x4xbf16>, vector<98x4xf32> -> vector<98x4xf32>
    %c0_3 = arith.constant 0 : index
    %c0_4 = arith.constant 0 : index
    %4 = vector.load %arg3[%c0_3, %c0_4] : memref<1x4xf32, #tpu.memory_space<vmem>>, vector<1x4xf32>
    %5 = vector.broadcast %4 : vector<1x4xf32> to vector<98x4xf32>
    %6 = arith.addf %3, %5 : vector<98x4xf32>
    %7 = arith.truncf %6 : vector<98x4xf32> to vector<98x4xbf16>
    %c0_5 = arith.constant 0 : index
    %c0_6 = arith.constant 0 : index
    %8 = vector.load %arg4[%c0_5, %c0_6] : memref<98x4xbf16, #tpu.memory_space<vmem>>, vector<98x4xbf16>
    tpu.vector_store %arg4[%c0_5, %c0_6], %7 {strides = array<i32>} : memref<98x4xbf16, #tpu.memory_space<vmem>>, vector<98x4xbf16>,
    return
  }
  func.func @transform_0(%arg0: i32) -> (i32, i32) {
    %c0_i32 = arith.constant 0 : i32
    %c0_i32_0 = arith.constant 0 : i32
    return %arg0, %c0_i32 : i32, i32
  }
  func.func @transform_1(%arg0: i32) -> (i32, i32) {
    %c0_i32 = arith.constant 0 : i32
    %c0_i32_0 = arith.constant 0 : i32
    %c0_i32_1 = arith.constant 0 : i32
    return %c0_i32, %c0_i32_0 : i32, i32
  }
  func.func @transform_2(%arg0: i32) -> (i32, i32) {
    %c0_i32 = arith.constant 0 : i32
    %c0_i32_0 = arith.constant 0 : i32
    %c0_i32_1 = arith.constant 0 : i32
    return %c0_i32, %c0_i32_0 : i32, i32
  }
  func.func @transform_3(%arg0: i32) -> (i32, i32) {
    %c0_i32 = arith.constant 0 : i32
    %c0_i32_0 = arith.constant 0 : i32
    return %arg0, %c0_i32 : i32, i32
  }
}

</mosaic_0001>

<bundles_post_ra>
// kernel: tpu_custom_call.1
= control target key start
LH: loop header
LB: loop body
LE: loop exit
PB: predicated region body
PF: predicated region fallthrough
CT: control target
= control target key end

     0   :  { %vm65_vm0 = vcmask 1043456   ;;  %v305_v0 = vmov 0.0   ;;  %vm306_vm1 = vmmov 0   ;;  %vm43_vm2 = vcmask 64512   ;;  %s452_s1 = inlined_call_operand.vmem [shape: bf16[8,4], index: 1, kind: input, shape index: {}]   ;;  %s453_s0 = inlined_call_operand.vmem [shape: f32[98,8], index: 0, kind: input, shape index: {}]   ;;  %s454_s2 = inlined_call_operand.vmem [shape: f32[1,4], index: 2, kind: input, shape index: {}]   ;;  %s455_s3 = inlined_call_operand.vmem [shape: bf16[98,4], index: 3, kind: output, shape index: {}]  }
   0x1   :  { %271 = vmatprep.subr.bf16.mxu0 %v305_v0  ;;  %v35_v1 = vld [vmem:[%s452_s1] sm:$0xf]  ;;  %273 = vmatprep.mubr.msk.bf16.mxu0 %vm306_vm1, %v305_v0  ;;  %v16_v3 = vld [vmem:[%s453_s0 + $0x8] sm:$0xff]  ;;  %v17_v9 = vld [vmem:[%s453_s0 + $0x10] sm:$0xff]  ;;  %vm210_vm3 = vcmask 27648   ;;  %vm223_vm4 = vcmask 24576  }
   0x2   :  { %v15_v2 = vld [vmem:[%s453_s0] sm:$0xff]  ;;  %v67_v4 = vsel %vm65_vm0, %v35_v1, 0  ;;  %301 = vmatprep.subr.bf16.mxu1 %v305_v0  ;;  %289 = vmatprep.mubr.msk.bf16.mxu1 %vm306_vm1, %v305_v0  ;;  %v24_v7 = vld [vmem:[%s453_s0 + $0x48] sm:$0xff]  ;;  %v18_v10 = vld [vmem:[%s453_s0 + $0x18] sm:$0xff] }
   0x3   :  { %v28_v5 = vpack.c.bf16 %v16_v3, %v15_v2  ;;  %v23_v6 = vld [vmem:[%s453_s0 + $0x40] sm:$0xff]  ;;  %272 = vmatpush3.bf16.msra.mxu0 %v67_v4  ;;  %302 = vmatpush3.bf16.msra.mxu1 %v67_v4  ;;  %v25_v11 = vld [vmem:[%s453_s0 + $0x50] sm:$0xff]  ;;  %v26_v12 = vld [vmem:[%s453_s0 + $0x58] sm:$0xff]  ;;  %v29_v13 = vpack.c.bf16 %v18_v10, %v17_v9 }
   0x4   :  { %v32_v8 = vpack.c.bf16 %v24_v7, %v23_v6  ;;  %v33_v14 = vpack.c.bf16 %v26_v12, %v25_v11  ;;  %v19_v15 = vld [vmem:[%s453_s0 + $0x20] sm:$0xff]  ;;  %v20_v16 = vld [vmem:[%s453_s0 + $0x28] sm:$0xff]  ;;  %v21_v20 = vld [vmem:[%s453_s0 + $0x30] sm:$0xff] }
   0x5   :  { %v27_v17 = vld [vmem:[%s453_s0 + $0x60] sm:$0x3]  ;;  %v30_v18 = vpack.c.bf16 %v20_v16, %v19_v15  ;;  %v22_v21 = vld [vmem:[%s453_s0 + $0x38] sm:$0xff] }
   0x6   :  { %274 = vmatmul.mubr.msk.bf16.vlgmr.msra.gmra.mxu0 %vm43_vm2, %v28_v5  ;;  %290 = vmatmul.mubr.msk.bf16.vlgmr.msra.gmra.mxu1 %vm43_vm2, %v32_v8  ;;  %v34_v19 = vpack.c.bf16 %v27_v17, %v27_v17  ;;  %v31_v22 = vpack.c.bf16 %v22_v21, %v21_v20  ;;  %v386_v23 = vld [vmem:[%s454_s2] ss:$0 sm:$0xff] }
   0x7   :  { %277 = vmatprep.mubr.msk.bf16.mxu0 %vm306_vm1, %v305_v0  ;;  %293 = vmatprep.mubr.msk.bf16.mxu1 %vm306_vm1, %v305_v0 }
   0xe   :  { %278 = vmatmul.mubr.msk.bf16.gmra.mxu0 %vm43_vm2, %v29_v13  ;;  %294 = vmatmul.mubr.msk.bf16.gmra.mxu1 %vm43_vm2, %v33_v14 }
   0xf   :  { %281 = vmatprep.mubr.msk.bf16.mxu0 %vm306_vm1, %v305_v0  ;;  %297 = vmatprep.mubr.msk.bf16.mxu1 %vm306_vm1, %v305_v0 }
  0x16   :  { %282 = vmatmul.mubr.msk.bf16.gmra.mxu0 %vm43_vm2, %v30_v18  ;;  %298 = vmatmul.mubr.msk.bf16.gmra.mxu1 %vm43_vm2, %v34_v19 }
  0x17   :  { %285 = vmatprep.mubr.msk.bf16.mxu0 %vm306_vm1, %v305_v0 }
  0x1e   :  { %286 = vmatmul.mubr.msk.bf16.gmra.mxu0 %vm43_vm2, %v31_v22 }
  0xc6   :  { %v103_v24 = vpop.f32.mrf.mxu0  ;;  %v135_v25 = vpop.f32.mrf.mxu1 }
  0xc7   :  { %v104_v26 = vadd.f32 %v386_v23, %v103_v24  ;;  %v136_v27 = vadd.f32 %v386_v23, %v135_v25 }
  0xc8   :  { %v275_v28 = vpop.f32.mrf.mxu0  ;;  %v291_v29 = vpop.f32.mrf.mxu1 }
  0xc9   :  { %v250_v30 = vpack.c.bf16 %v104_v26, %v104_v26  ;;  %v258_v31 = vpack.c.bf16 %v136_v27, %v136_v27 }
  0xca   :  { %v106_v32 = vpop.f32.mrf.mxu0  ;;  %v138_v33 = vpop.f32.mrf.mxu1 }
  0xcb   :  { %211 = vst.msk [vmem:[%s455_s3] sm:$0xf] %vm210_vm3, %v250_v30  ;;  %v107_v34 = vadd.f32 %v386_v23, %v106_v32  ;;  %219 = vst.msk [vmem:[%s455_s3 + $0x20] sm:$0xf] %vm210_vm3, %v258_v31  ;;  %v139_v35 = vadd.f32 %v386_v23, %v138_v33 }
  0xcc   :  { %v276_v36 = vpop.f32.mrf.mxu0  ;;  %v292_v37 = vpop.f32.mrf.mxu1 }
  0xcd   :  { %v251_v38 = vpack.c.bf16 %v107_v34, %v107_v34  ;;  %v259_v39 = vpack.c.bf16 %v139_v35, %v139_v35 }
  0xce   :  { %v111_v40 = vpop.f32.mrf.mxu0  ;;  %v143_v41 = vpop.f32.mrf.mxu1 }
  0xcf   :  { %212 = vst.msk [vmem:[%s455_s3 + $0x4] sm:$0xf] %vm210_vm3, %v251_v38  ;;  %v112_v42 = vadd.f32 %v386_v23, %v111_v40  ;;  %220 = vst.msk [vmem:[%s455_s3 + $0x24] sm:$0xf] %vm210_vm3, %v259_v39  ;;  %v144_v43 = vadd.f32 %v386_v23, %v143_v41 }
  0xd0   :  { %v279_v44 = vpop.f32.mrf.mxu0  ;;  %v295_v45 = vpop.f32.mrf.mxu1 }
  0xd1   :  { %v252_v46 = vpack.c.bf16 %v112_v42, %v112_v42  ;;  %v260_v47 = vpack.c.bf16 %v144_v43, %v144_v43 }
  0xd2   :  { %v114_v48 = vpop.f32.mrf.mxu0  ;;  %v146_v49 = vpop.f32.mrf.mxu1 }
  0xd3   :  { %213 = vst.msk [vmem:[%s455_s3 + $0x8] sm:$0xf] %vm210_vm3, %v252_v46  ;;  %v115_v50 = vadd.f32 %v386_v23, %v114_v48  ;;  %221 = vst.msk [vmem:[%s455_s3 + $0x28] sm:$0xf] %vm210_vm3, %v260_v47  ;;  %v147_v51 = vadd.f32 %v386_v23, %v146_v49 }
  0xd4   :  { %v280_v52 = vpop.f32.mrf.mxu0  ;;  %v296_v53 = vpop.f32.mrf.mxu1 }
  0xd5   :  { %v253_v54 = vpack.c.bf16 %v115_v50, %v115_v50  ;;  %v261_v55 = vpack.c.bf16 %v147_v51, %v147_v51 }
  0xd6   :  { %v119_v56 = vpop.f32.mrf.mxu0  ;;  %v151_v57 = vpop.f32.mrf.mxu1 }
  0xd7   :  { %214 = vst.msk [vmem:[%s455_s3 + $0xc] sm:$0xf] %vm210_vm3, %v253_v54  ;;  %v120_v58 = vadd.f32 %v386_v23, %v119_v56  ;;  %222 = vst.msk [vmem:[%s455_s3 + $0x2c] sm:$0xf] %vm210_vm3, %v261_v55  ;;  %v152_v59 = vadd.f32 %v386_v23, %v151_v57 }
  0xd8   :  { %v283_v60 = vpop.f32.mrf.mxu0  ;;  %v299_v61 = vpop.f32.mrf.mxu1 }
  0xd9   :  { %v254_v62 = vpack.c.bf16 %v120_v58, %v120_v58  ;;  %v262_v63 = vpack.c.bf16 %v152_v59, %v152_v59 }
  0xda   :  { %v122_v0 = vpop.f32.mrf.mxu0  ;;  %v154_v1 = vpop.f32.mrf.mxu1 }
  0xdb   :  { %215 = vst.msk [vmem:[%s455_s3 + $0x10] sm:$0xf] %vm210_vm3, %v254_v62  ;;  %v123_v2 = vadd.f32 %v386_v23, %v122_v0 }
  0xdc   :  { %224 = vst.msk [vmem:[%s455_s3 + $0x30] sm:$0x1] %vm223_vm4, %v262_v63  ;;  %v284_v3 = vpop.f32.mrf.mxu0  ;;  %v300_v4 = vpop.f32.mrf.mxu1 }
  0xdd   :  { %v255_v5 = vpack.c.bf16 %v123_v2, %v123_v2 }
  0xde   :  { %v127_v6 = vpop.f32.mrf.mxu0 }
  0xdf   :  { %216 = vst.msk [vmem:[%s455_s3 + $0x14] sm:$0xf] %vm210_vm3, %v255_v5  ;;  %v128_v7 = vadd.f32 %v386_v23, %v127_v6 }
  0xe0   :  { %v287_v8 = vpop.f32.mrf.mxu0 }
  0xe1   :  { %v256_v9 = vpack.c.bf16 %v128_v7, %v128_v7 }
  0xe2   :  { %v130_v10 = vpop.f32.mrf.mxu0 }
  0xe3   :  { %217 = vst.msk [vmem:[%s455_s3 + $0x18] sm:$0xf] %vm210_vm3, %v256_v9  ;;  %v131_v11 = vadd.f32 %v386_v23, %v130_v10 }
  0xe4   :  { %v288_v12 = vpop.f32.mrf.mxu0 }
  0xe5   :  { %v257_v13 = vpack.c.bf16 %v131_v11, %v131_v11 }
  0xe7   :  { %218 = vst.msk [vmem:[%s455_s3 + $0x1c] sm:$0xf] %vm210_vm3, %v257_v13 }

</bundles_post_ra>
